<compile_context>
chip_gen: v6e
topology: v6e:2x2x1
jax: 0.10.0
libtpu: 0.0.40
codegen_flags: <defaults>
</compile_context>

<pallas_src>
import functools

import jax
import jax.numpy as jnp
from jax.experimental import pallas as pl
from jax.experimental.pallas import tpu as pltpu


# ----------------------------------------------------------------------------
# Kernel
# ----------------------------------------------------------------------------
def _emotion_head_kernel(x_ref, w_ref, b_ref, out_ref, acc_ref, *,
                         seq_len, time_tile, needs_mask, split_time):
    """Grid = (parallel axis, inner time tiles); axis 1 is the reduction."""
    k = pl.program_id(1)
    n_k = pl.num_programs(1)

    # Zero the temporal-sum accumulator at the start of each parallel slice.
    @pl.when(k == 0)
    def _():
        acc_ref[...] = jnp.zeros_like(acc_ref)

    if needs_mask:
        # Global time-tile index (time split across the parallel axis or not).
        if split_time:
            g = pl.program_id(0) * n_k + k
        else:
            g = k
        tile_start = g * time_tile
        is_full = (tile_start + time_tile) <= seq_len

        # Fast path: full tile, just cast + add (hot path for (n-1)/n tiles).
        @pl.when(is_full)
        def _():
            acc_ref[...] += jnp.sum(x_ref[...].astype(jnp.float32), axis=1)

        # Slow path: boundary (or phantom) tile, mask rows past seq_len.
        @pl.when(jnp.logical_not(is_full))
        def _():
            t_idx = tile_start + jax.lax.broadcasted_iota(
                jnp.int32, (1, time_tile, 1), 1)
            x_t = jnp.where(t_idx < seq_len,
                            x_ref[...].astype(jnp.float32), 0.0)
            acc_ref[...] += jnp.sum(x_t, axis=1)
    else:
        acc_ref[...] += jnp.sum(x_ref[...].astype(jnp.float32), axis=1)

    # Last inner tile: finish mean and run the fused [D, 13] head matmul.
    @pl.when(k == n_k - 1)
    def _():
        mean_x = acc_ref[...] * (1.0 / seq_len)                    # [rows, D]
        head = jnp.dot(mean_x, w_ref[...].astype(jnp.float32),
                       preferred_element_type=jnp.float32)         # [rows, 13]
        if split_time:
            # Partial contribution of this time half; bias is added once in
            # the wrapper after combining the two halves.
            out_ref[...] = head[None]                              # [1, B, 13]
        else:
            out_ref[...] = head + b_ref[...].astype(jnp.float32)


# ----------------------------------------------------------------------------
# Hardware / tiling heuristics
# ----------------------------------------------------------------------------
def _sublane(dtype):
    itemsize = jnp.dtype(dtype).itemsize
    return {4: 8, 2: 16, 1: 32}.get(itemsize, 8)


def _tpu_vmem_info():
    """Returns (per-TensorCore VMEM bytes, is_v7x). Generation-aware."""
    kind = ""
    try:
        kind = jax.devices()[0].device_kind.lower()
    except Exception:
        pass
    is_v7 = ("v7" in kind) or ("7x" in kind)
    cap = None
    try:
        info = pltpu.get_tpu_info()
        val = getattr(info, "vmem_capacity_bytes", None)
        if val:
            cap = int(val)
    except Exception:
        cap = None
    if cap is None:
        cap = (64 if is_v7 else 128) * 1024 * 1024   # v5e/v6e: 128 MiB
    if is_v7:
        # get_tpu_info may report per-chip capacity; clamp to per-TC 64 MiB.
        cap = min(cap, 64 * 1024 * 1024)
    return cap, is_v7


def _auto_time_tile(rows, T, D, itemsize, sublane, budget):
    per_row = 2 * rows * D * itemsize           # double-buffered x stream
    max_rows = budget // max(per_row, 1)
    if max_rows >= T:
        return T                                # whole sequence in one block
    tile = max((max_rows // sublane) * sublane, sublane)
    # Snap down to a nearby divisor of T (>= tile/2) so the mask path vanishes.
    for cand in range(tile, sublane - 1, -sublane):
        if T % cand == 0:
            if 2 * cand >= tile:
                tile = cand
            break
    return tile


# ----------------------------------------------------------------------------
# Wrapper
# ----------------------------------------------------------------------------
def emotion_predictor_heads(x, w_all, b_all, *, time_tile=None, batch_tile=None):
    """Fused mean-over-time + 4 linear heads (A, V, D, C).

    x:     [B, T, D] encoder_last_hidden_state (float32 or bfloat16). For best
           performance have the encoder emit bf16 directly (kernel is HBM
           bound; it accumulates in f32 internally).
    w_all: [D, 13] fused head weights (cols 0..2 = A,V,D; cols 3..12 = C).
    b_all: [1, 13] fused head bias.
    Returns (A[B], V[B], D[B], C[B, 10]).
    """
    B, T, D = x.shape
    n_out = w_all.shape[1]
    itemsize = jnp.dtype(x.dtype).itemsize
    sublane = _sublane(x.dtype)

    cap, is_v7 = _tpu_vmem_info()
    # Scoped-VMEM limit: above the small defaults, with Mosaic-scratch headroom
    # (v7x per-TC VMEM is only 64 MiB -> cap at 56 MiB there).
    hard_cap = (56 if is_v7 else 100) * 1024 * 1024
    vmem_limit = max(32 * 1024 * 1024, min(int(cap * 0.85), hard_cap))
    budget = int(vmem_limit * 0.70)             # x-stream (double-buffered)

    # Parallel axis: split the batch when legal, otherwise split the time axis
    # two ways so the "parallel" grid axis is always >= 2 wide (v7x megacore).
    if batch_tile is not None:
        assert B % batch_tile == 0, "batch_tile must divide B"
        split_time = (B // batch_tile) < 2
        if not split_time:
            assert batch_tile % 8 == 0, "batch_tile must be a multiple of 8"
    elif B % 16 == 0 and B >= 16:
        batch_tile, split_time = B // 2, False
    elif B % 8 == 0 and B >= 16:
        batch_tile, split_time = 8, False
    else:
        batch_tile, split_time = B, True
    rows = batch_tile

    # Time tiling.
    if time_tile is None:
        time_tile = _auto_time_tile(rows, T, D, itemsize, sublane, budget)
        if split_time:
            # Cap so each of the two parallel halves streams real data.
            half = sublane * pl.cdiv(pl.cdiv(T, 2), sublane)
            if half < T:
                time_tile = min(time_tile, half)
    assert time_tile == T or time_tile % sublane == 0, (
        f"time_tile must equal T or be a multiple of {sublane} for {x.dtype}")

    n_blocks_t = pl.cdiv(T, time_tile)
    if split_time:
        n_par = 2
        n_inner = pl.cdiv(n_blocks_t, 2)
        needs_mask = (n_par * n_inner * time_tile) != T
    else:
        n_par = B // batch_tile
        n_inner = n_blocks_t
        needs_mask = (T % time_tile) != 0

    # Degenerate-case guard: make sure the chosen tiles fit under the limit
    # (double-buffered x + resident w/b/out + f32 accumulator).
    x_blk_bytes = 2 * rows * time_tile * D * itemsize
    resident = rows * D * 4 + 2 * D * n_out * 4 + 2 * (rows + 1) * n_out * 4
    vmem_limit = max(vmem_limit,
                     min(int(cap * 0.95), x_blk_bytes + resident + (2 << 20)))

    kernel = functools.partial(
        _emotion_head_kernel, seq_len=T, time_tile=time_tile,
        needs_mask=needs_mask, split_time=split_time)

    cost = pl.CostEstimate(
        flops=B * T * D + 2 * B * D * n_out,
        transcendentals=0,
        bytes_accessed=(B * T * D * itemsize
                        + D * n_out * jnp.dtype(w_all.dtype).itemsize
                        + n_par * B * n_out * 4))

    last_blk = n_blocks_t - 1
    if split_time:
        # Global time-tile = p * n_inner + k; clamp phantom tiles (fully
        # masked in-kernel) so the DMA never indexes past the array.
        x_map = lambda p, k: (0, jnp.minimum(p * n_inner + k, last_blk), 0)
        out_shape = jax.ShapeDtypeStruct((n_par, B, n_out), jnp.float32)
        out_spec = pl.BlockSpec((1, B, n_out), lambda p, k: (p, 0, 0))
    else:
        x_map = lambda i, k: (i, k, 0)
        out_shape = jax.ShapeDtypeStruct((B, n_out), jnp.float32)
        out_spec = pl.BlockSpec((batch_tile, n_out), lambda i, k: (i, 0))

    out = pl.pallas_call(
        kernel,
        out_shape=out_shape,
        grid_spec=pltpu.PrefetchScalarGridSpec(
            num_scalar_prefetch=0,
            grid=(n_par, n_inner),
            in_specs=[
                pl.BlockSpec((rows, time_tile, D), x_map),
                # Constant index maps: Pallas keeps one resident copy of w/b
                # (no per-step re-DMA); default 2-deep buffering elsewhere.
                pl.BlockSpec((D, n_out), lambda i, k: (0, 0)),
                pl.BlockSpec((1, n_out), lambda i, k: (0, 0)),
            ],
            out_specs=out_spec,
            scratch_shapes=[pltpu.VMEM((rows, D), jnp.float32)],
        ),
        compiler_params=pltpu.CompilerParams(
            dimension_semantics=("parallel", "arbitrary"),
            vmem_limit_bytes=vmem_limit,
        ),
        cost_estimate=cost,
    )(x, w_all, b_all)

    if split_time:
        # Combine the two parallel partial (sum/T) @ W results, add bias once.
        out = out[0] + out[1] + b_all
    return out[:, 0], out[:, 1], out[:, 2], out[:, 3:13]


# ----------------------------------------------------------------------------
# Parameter init (mimics nn.Linear defaults) + pure-JAX reference
# ----------------------------------------------------------------------------
def init_head_params(key, ssl_out_dim):
    """U(-1/sqrt(in), 1/sqrt(in)) init; fuse A, V, D (D->1 each) and C (D->10)
       into a single [D, 13] weight and [1, 13] bias."""
    bound = 1.0 / jnp.sqrt(jnp.float32(ssl_out_dim))
    keys = jax.random.split(key, 8)
    w_A = jax.random.uniform(keys[0], (1, ssl_out_dim), jnp.float32, -bound, bound)
    b_A = jax.random.uniform(keys[1], (1,), jnp.float32, -bound, bound)
    w_V = jax.random.uniform(keys[2], (1, ssl_out_dim), jnp.float32, -bound, bound)
    b_V = jax.random.uniform(keys[3], (1,), jnp.float32, -bound, bound)
    w_D = jax.random.uniform(keys[4], (1, ssl_out_dim), jnp.float32, -bound, bound)
    b_D = jax.random.uniform(keys[5], (1,), jnp.float32, -bound, bound)
    w_C = jax.random.uniform(keys[6], (10, ssl_out_dim), jnp.float32, -bound, bound)
    b_C = jax.random.uniform(keys[7], (10,), jnp.float32, -bound, bound)
    # PyTorch Linear computes x @ W.T + b; stack transposed weights column-wise.
    w_all = jnp.concatenate([w_A, w_V, w_D, w_C], axis=0).T      # [D, 13]
    b_all = jnp.concatenate([b_A, b_V, b_D, b_C], axis=0)[None]  # [1, 13]
    return w_all, b_all


def reference(x, w_all, b_all):
    mean_x = jnp.mean(x.astype(jnp.float32), axis=1)
    out = mean_x @ w_all + b_all
    return out[:, 0], out[:, 1], out[:, 2], out[:, 3:13]


# ----------------------------------------------------------------------------
# Self-test
# ----------------------------------------------------------------------------
if __name__ == "__main__":
    key = jax.random.PRNGKey(0)
    k_x, k_p, k_x2, k_x3 = jax.random.split(key, 4)

    # --- Test 1: small f32 case (B=2 -> time-split parallel path). ---------
    B, T, D = 2, 16, 32
    x = jax.random.normal(k_x, (B, T, D), jnp.float32)
    w_all, b_all = init_head_params(k_p, D)

    out_A, out_V, out_D, out_C = emotion_predictor_heads(x, w_all, b_all)
    jax.block_until_ready((out_A, out_V, out_D, out_C))

    ref_A, ref_V, ref_D, ref_C = reference(x, w_all, b_all)
    assert out_A.shape == (B,) and out_V.shape == (B,)
    assert out_D.shape == (B,) and out_C.shape == (B, 10)
    assert jnp.allclose(out_A, ref_A, atol=1e-5)
    assert jnp.allclose(out_V, ref_V, atol=1e-5)
    assert jnp.allclose(out_D, ref_D, atol=1e-5)
    assert jnp.allclose(out_C, ref_C, atol=1e-5)

    # --- Test 2: ragged T (not a multiple of the tile) -> gated masked tile.
    T2 = 20
    x2 = jax.random.normal(k_x2, (B, T2, D), jnp.float32)
    o2 = emotion_predictor_heads(x2, w_all, b_all, time_tile=8)
    jax.block_until_ready(o2)
    r2 = reference(x2, w_all, b_all)
    for o, r in zip(o2, r2):
        assert jnp.allclose(o, r, atol=1e-5)

    # --- Test 3: bf16 hidden states (f32 accumulation inside the kernel). --
    x_bf16 = x.astype(jnp.bfloat16)
    o3 = emotion_predictor_heads(x_bf16, w_all, b_all)
    jax.block_until_ready(o3)
    r3 = reference(x_bf16, w_all, b_all)
    for o, r in zip(o3, r3):
        assert jnp.allclose(o, r, atol=2e-2)

    # --- Test 4: batch split across two tiles (batch-parallel path). -------
    B4, T4 = 16, 24
    x4 = jax.random.normal(k_x3, (B4, T4, D), jnp.float32)
    o4 = emotion_predictor_heads(x4, w_all, b_all)
    jax.block_until_ready(o4)
    r4 = reference(x4, w_all, b_all)
    for o, r in zip(o4, r4):
        assert jnp.allclose(o, r, atol=1e-5)

    print("KERNEL_OK")
</pallas_src>

<mosaic_0001>
module attributes {stable_mosaic.version = 11 : i64} {
  func.func @_emotion_head_kernel(%arg0: i32, %arg1: i32, %arg2: memref<2x8x32xf32, #tpu.memory_space<vmem>>, %arg3: memref<32x13xf32, #tpu.memory_space<vmem>>, %arg4: memref<1x13xf32, #tpu.memory_space<vmem>>, %arg5: memref<1x2x13xf32, #tpu.memory_space<vmem>>, %arg6: memref<2x32xf32, #tpu.memory_space<vmem>>) attributes {dimension_semantics = [#tpu.dimension_semantics<parallel>, #tpu.dimension_semantics<arbitrary>], iteration_bounds = array<i64: 2, 1>, scalar_prefetch = 0 : i64, scratch_operands = 1 : i64, tpu.core_type = #tpu.core_type<tc>, window_params = [{transform_indices = @transform_0, window_bounds = array<i64: 2, 8, 32>}, {pipeline_mode = #tpu.pipeline_mode<synchronous>, transform_indices = @transform_1, window_bounds = array<i64: 32, 13>}, {pipeline_mode = #tpu.pipeline_mode<synchronous>, transform_indices = @transform_2, window_bounds = array<i64: 1, 13>}, {transform_indices = @transform_3, window_bounds = array<i64: 1, 2, 13>}]} {
    %c0_i32 = arith.constant 0 : i32
    %0 = arith.cmpi eq, %arg1, %c0_i32 : i32
    %1 = arith.extui %0 : i1 to i32
    %c0_i32_0 = arith.constant 0 : i32
    %2 = arith.cmpi ne, %1, %c0_i32_0 : i32
    scf.if %2 {
      %cst_9 = arith.constant 0.000000e+00 : f32
      %11 = vector.broadcast %cst_9 : f32 to vector<2x32xf32>
      %c0_10 = arith.constant 0 : index
      %c0_11 = arith.constant 0 : index
      %12 = vector.load %arg6[%c0_10, %c0_11] : memref<2x32xf32, #tpu.memory_space<vmem>>, vector<2x32xf32>
      tpu.vector_store %arg6[%c0_10, %c0_11], %11 {strides = array<i32>} : memref<2x32xf32, #tpu.memory_space<vmem>>, vector<2x32xf32>,
    } else {
    }
    %c0 = arith.constant 0 : index
    %c0_1 = arith.constant 0 : index
    %3 = vector.load %arg6[%c0, %c0_1] : memref<2x32xf32, #tpu.memory_space<vmem>>, vector<2x32xf32>
    %c0_2 = arith.constant 0 : index
    %c0_3 = arith.constant 0 : index
    %c0_4 = arith.constant 0 : index
    %4 = vector.load %arg2[%c0_2, %c0_3, %c0_4] : memref<2x8x32xf32, #tpu.memory_space<vmem>>, vector<2x8x32xf32>
    %cst = arith.constant dense<0.000000e+00> : vector<2x32xf32>
    %5 = vector.multi_reduction <add>, %4, %cst [1] : vector<2x8x32xf32> to vector<2x32xf32>
    %6 = arith.addf %3, %5 : vector<2x32xf32>
    %c0_5 = arith.constant 0 : index
    %c0_6 = arith.constant 0 : index
    %7 = vector.load %arg6[%c0_5, %c0_6] : memref<2x32xf32, #tpu.memory_space<vmem>>, vector<2x32xf32>
    tpu.vector_store %arg6[%c0_5, %c0_6], %6 {strides = array<i32>} : memref<2x32xf32, #tpu.memory_space<vmem>>, vector<2x32xf32>,
    %c0_i32_7 = arith.constant 0 : i32
    %8 = arith.cmpi eq, %arg1, %c0_i32_7 : i32
    %9 = arith.extui %8 : i1 to i32
    %c0_i32_8 = arith.constant 0 : i32
    %10 = arith.cmpi ne, %9, %c0_i32_8 : i32
    scf.if %10 {
      %c0_9 = arith.constant 0 : index
      %c0_10 = arith.constant 0 : index
      %11 = vector.load %arg6[%c0_9, %c0_10] : memref<2x32xf32, #tpu.memory_space<vmem>>, vector<2x32xf32>
      %cst_11 = arith.constant 6.250000e-02 : f32
      %12 = vector.broadcast %cst_11 : f32 to vector<2x32xf32>
      %13 = arith.mulf %11, %12 : vector<2x32xf32>
      %c0_12 = arith.constant 0 : index
      %c0_13 = arith.constant 0 : index
      %14 = vector.load %arg3[%c0_12, %c0_13] : memref<32x13xf32, #tpu.memory_space<vmem>>, vector<32x13xf32>
      %cst_14 = arith.constant dense<0.000000e+00> : vector<2x13xf32>
      %15 = tpu.matmul %13, %14, %cst_14 {dimension_numbers = #tpu.dot_dimension_numbers<[1], [0], [0], [1], [0, 0, 1, 1], [], []>} : vector<2x32xf32>, vector<32x13xf32>, vector<2x13xf32> -> vector<2x13xf32>
      %16 = vector.shape_cast %15 : vector<2x13xf32> to vector<1x2x13xf32>
      %c0_15 = arith.constant 0 : index
      %c0_16 = arith.constant 0 : index
      %c0_17 = arith.constant 0 : index
      %17 = vector.load %arg5[%c0_15, %c0_16, %c0_17] : memref<1x2x13xf32, #tpu.memory_space<vmem>>, vector<1x2x13xf32>
      tpu.vector_store %arg5[%c0_15, %c0_16, %c0_17], %16 {strides = array<i32>} : memref<1x2x13xf32, #tpu.memory_space<vmem>>, vector<1x2x13xf32>,
    } else {
    }
    return
  }
  func.func @transform_0(%arg0: i32, %arg1: i32) -> (i32, i32, i32) {
    %c1_i32 = arith.constant 1 : i32
    %0 = arith.muli %arg0, %c1_i32 : i32
    %1 = arith.addi %0, %arg1 : i32
    %c1_i32_0 = arith.constant 1 : i32
    %2 = arith.minsi %1, %c1_i32_0 : i32
    %c0_i32 = arith.constant 0 : i32
    %c0_i32_1 = arith.constant 0 : i32
    %c0_i32_2 = arith.constant 0 : i32
    return %c0_i32, %2, %c0_i32_1 : i32, i32, i32
  }
  func.func @transform_1(%arg0: i32, %arg1: i32) -> (i32, i32) {
    %c0_i32 = arith.constant 0 : i32
    %c0_i32_0 = arith.constant 0 : i32
    %c0_i32_1 = arith.constant 0 : i32
    return %c0_i32, %c0_i32_0 : i32, i32
  }
  func.func @transform_2(%arg0: i32, %arg1: i32) -> (i32, i32) {
    %c0_i32 = arith.constant 0 : i32
    %c0_i32_0 = arith.constant 0 : i32
    %c0_i32_1 = arith.constant 0 : i32
    return %c0_i32, %c0_i32_0 : i32, i32
  }
  func.func @transform_3(%arg0: i32, %arg1: i32) -> (i32, i32, i32) {
    %c0_i32 = arith.constant 0 : i32
    %c0_i32_0 = arith.constant 0 : i32
    %c0_i32_1 = arith.constant 0 : i32
    return %arg0, %c0_i32, %c0_i32_0 : i32, i32, i32
  }
}

</mosaic_0001>

<bundles_post_ra>
// kernel: tpu_custom_call.1
= control target key start
LH: loop header
LB: loop body
LE: loop exit
PB: predicated region body
PF: predicated region fallthrough
CT: control target
= control target key end

     0   :  { %8 = vsyncpa [#allocation5], 0  ;;  %s820_s0 = inlined_call_operand.vmem [shape: f32[2,16,32], index: 0, kind: input, shape index: {}]   ;;  %s821_s1 = inlined_call_operand.vmem [shape: f32[32,13], index: 1, kind: input, shape index: {}]   ;;  %s822_s2 = inlined_call_operand.vmem [shape: f32[1,13], index: 2, kind: input, shape index: {}]   ;;  %s823_s3 = inlined_call_operand.hbm [shape: f32[2,2,13], index: 3, kind: output, shape index: {}]  }
   0x1   :  { %10 = vsyncpa [#allocation5 + $0x1], 0  ;;  %s655_s12 = smov 0   ;;  %s657_s13 = smov 0  }
   0x2   :  { %s659_s14 = smov 0   ;;  %s661_s15 = smov 0  }
   0x3   :  { %s663_s16 = smov 0   ;;  %s665_s17 = smov 0  }
   0x4   :  { %s667_s18 = smov 0   ;;  %s669_s2 = smov 0  }
   0x5 LB: > { %s435_s19 = sadd.s32 4294967295, %s630_s2   ;;  %s436_s20 = sadd.s32 4294967294, %s630_s2   ;;  %s630_s2 = sphi %s669_s2, %s16_s2   ;;  %s626_s18 = sphi %s667_s18, %s833_s18   ;;  %s622_s17 = sphi %s665_s17, %s832_s17   ;;  %s618_s16 = sphi %s663_s16, %s831_s16   ;;  %s614_s15 = sphi %s661_s15, %s830_s15   ;;  %s610_s14 = sphi %s659_s14, %s829_s14   ;;  %s606_s13 = sphi %s657_s13, %s828_s13   ;;  %s602_s12 = sphi %s655_s12, %s827_s12  }
   0x6   : > { %s28_s21 = sadd.s32 1, %s626_s18  ;;  %p33_p0 = scmp.lt.s32.totalorder %s626_s18, 1 }
   0x7   : > { %p30_p1 = scmp.ge.s32.totalorder %s28_s21, 2  ;;  %s41_s22 = sadd.s32 1, %s618_s16 }
   0x8   : > { %s34_s23 = scalar_select %p33_p0, %s626_s18, 1 }
   0x9   : > { %s835_s21 = smov (%p30_p1, %s28_s21), 0  ;;  %p48_p2 = scmp.ne.s32.totalorder %s618_s16, %s614_s15 }
   0xa   : > { %p49_p3 = scmp.eq.s32.totalorder %s630_s2, 0  ;;  %p36_p4 = scmp.lt.s32.totalorder %s835_s21, 1 }
   0xb   : > { %s106_s24 = ssub.s32 %s626_s18, %s835_s21  ;;  %s109_s27 = sadd.s32 1, %s610_s14 }
   0xc   : > { %p709_p5 = por %p49_p3, %p48_p2  ;;  %p107_p6 = scmp.eq.s32.totalorder %s106_s24, 0 }
   0xd   : > { %s37_s26 = scalar_select %p36_p4, %s835_s21, 1 }
   0xe   : > { %p119_p7 = scmp.ne.s32.totalorder %s610_s14, %s606_s13  ;;  %p120_p8 = scmp.eq.s32.totalorder %s435_s19, 1 }
   0xf   : > { %s38_s28 = ssub.s32 %s34_s23, %s37_s26  ;;  %p125_p10 = scmp.ne.s32.totalorder %s606_s13, %s602_s12 }
  0x10   : > { %p39_p9 = scmp.eq.s32.totalorder %s38_s28, 0  ;;  %p725_p11 = por %p120_p8, %p119_p7 }
  0x11   : > { %s720_s29 = scalar_select %p107_p6, %s610_s14, %s109_s27  }
  0x12   : > { %s723_s30 = scalar_select %p39_p9, %s618_s16, %s41_s22  }
  0x13   : > { %p126_p12 = scmp.eq.s32.totalorder %s436_s20, 1  ;;  %p438_p0 = scmp.ge.s32.totalorder %s630_s2, 2 }
  0x15   : > { %p729_p13 = por %p126_p12, %p125_p10  ;;  %148 = sbr.rel (%p438_p0) target bundleno = 31 (0x1f), region = 24 }
  0x1a   : > { %151 = sbr.rel (!%p709_p5) target bundleno = 31 (0x1f), region = 28  ;;  %s153_s6 = sand.u32 (%p709_p5), 1, %s618_s16  }
  0x1b   : > { %s440_s7 = sshll.u32 (%p709_p5), %s34_s23, 3  ;;  %s439_s8 = sshll.u32 (%p709_p5), %s153_s6, 4 }
  0x1c   : > { %s160_s11 = scalar_lea.vmem (%p709_p5), %s820_s0, %s440_s7  ;;  %s155_s19 = scalar_lea.vmem (%p709_p5), [#allocation3], %s439_s8 }
  0x1d   : > { %v191_v0 = vld [vmem:[%s160_s11] sm:$0xff] (%p709_p5)  ;;  %v193_v1 = vld [vmem:[%s160_s11 + $0x10] sm:$0xff] (%p709_p5) }
  0x1e   : > { %192 = vst [vmem:[%s155_s19] sm:$0xff] (%p709_p5), %v191_v0  ;;  %194 = vst [vmem:[%s155_s19 + $0x8] sm:$0xff] (%p709_p5), %v193_v1 }
  0x1f PF: > { %p441_p1 = scmp.ge.s32.totalorder %s630_s2, 1  ;;  %p199_p2 = scmp.lt.s32.totalorder %s630_s2, 3 }
  0x21   : > { %p200_p3 = pnand %p441_p1, %p199_p2 }
  0x22   : > { %s206_s25 = sand.u32 (!%p200_p3), 1, %s614_s15   ;;  %s226_s15 = sand.u32 (!%p200_p3), 1, %s606_s13  }
  0x23   : > { %203 = sbr.rel (%p200_p3) target bundleno = 276 (0x114), region = 66  ;;  %s442_s26 = sshll.u32 (!%p200_p3), %s206_s25, 4 }
  0x24   : > { %s208_s6 = scalar_lea.vmem (!%p200_p3), [#allocation3], %s442_s26  ;;  %s443_s9 = sshll.u32 (!%p200_p3), %s226_s15, 1 }
  0x25   : > { %s446_s10 = sshll.u32 (!%p200_p3), %s622_s17, 5  ;;  %s228_s11 = scalar_lea.vmem (!%p200_p3), [#allocation4], %s443_s9 }
  0x26   : > { %s362_s19 = sshll.u32 (!%p200_p3), %s228_s11, 4  ;;  %s767_s23 = scalar_lea.hbm (!%p200_p3), %s823_s3, %s446_s10  ;;  %s769_s19 = int_to_ptr.vmem [resolvable:$true] %s362_s19 }
  0x27   : > { %s349_s24 = scalar_lea.sflag (!%p200_p3), [#allocation5], %s226_s15  ;;  %s538_s25 = scalar_lea.vmem (!%p200_p3), %s769_s19, 32 }
  0x28   : > { %vm236_vm0 = vcmask 254976   ;;  %v272_v2 = vld [vmem:[%s821_s1 + $0x18] sm:$0xff]  ;;  %v632_v3 = vmov 0.0   ;;  %v271_v4 = vld [vmem:[%s821_s1 + $0x10] sm:$0xff]  ;;  %vm633_vm1 = vmmov 0   ;;  %vm241_vm2 = vcmask 261120   ;;  %p539_p4 = scmp.ne.s32.totalorder %s769_s19, %s538_s25 }
  0x29   : > { %237 = vst.msk [vmem:[#allocation2] sm:$0x3] %vm236_vm0, %v632_v3  ;;  %454 = vmatprep.subr.mxu0 %v632_v3  ;;  %462 = vmatprep.mubr.msk.f32.mxu0 %vm633_vm1, %v632_v3  ;;  %v270_v5 = vld [vmem:[%s821_s1 + $0x8] sm:$0xff]  ;;  %v269_v8 = vld [vmem:[%s821_s1] sm:$0xff]  ;;  %vm258_vm3 = vcmask 1041409   ;;  %vm346_vm4 = vcmask 99328  }
  0x2a   : > { %455 = vmatpush3.msra.mxu0 %v272_v2  ;;  %v239_v6 = vld [vmem:[%s208_s6] sm:$0xff]  ;;  %v240_v7 = vld [vmem:[%s208_s6 + $0x8] sm:$0xff]  ;;  %p540_p5 = pnand %p539_p4, %p725_p11  ;;  %s634_s17 = smov [#allocation4]  }
  0x2b   : > { %456 = vmatprep.subr.mxu0 %v632_v3  ;;  %v242_v9 = vsel %vm241_vm2, %v239_v6, 0.0  ;;  %v249_v10 = vsel %vm241_vm2, %v240_v7, 0.0  ;;  %s542_s26 = sshll.u32 %s634_s17, 4  ;;  %s543_s26 = int_to_ptr.vmem [resolvable:$false] %s542_s26 }
  0x2c   : > { %457 = vmatpush3.msra.mxu0 %v271_v4  ;;  %v243_v11 = vrot.slane %v242_v9, 4  ;;  %v250_v12 = vrot.slane %v249_v10, 4  ;;  %p541_p6 = pneg %p540_p5  ;;  %s544_s27 = scalar_lea.vmem %s543_s26, 64 }
  0x2d   : > { %458 = vmatprep.subr.mxu0 %v632_v3  ;;  %p545_p7 = scmp.lt.s32.totalorder %s769_s19, %s543_s26  ;;  %p546_p8 = scmp.lt.s32.totalorder %s544_s27, %s538_s25 }
  0x2e   : > { %459 = vmatpush3.msra.mxu0 %v270_v5  ;;  %v244_v13 = vadd.f32 %v243_v11, %v242_v9  ;;  %v251_v14 = vadd.f32 %v250_v12, %v249_v10 }
  0x2f   : > { %460 = vmatprep.subr.mxu0 %v632_v3  ;;  %p547_p9 = por %p546_p8, %p545_p7 }
  0x30   : > { %461 = vmatpush3.msra.mxu0 %v269_v8  ;;  %v245_v15 = vrot.slane %v244_v13, 2  ;;  %v252_v16 = vrot.slane %v251_v14, 2  ;;  %v238_v21 = vld [vmem:[#allocation2] sm:$0x3] }
  0x31   : > { %p548_p10 = pnand %p547_p9, %p541_p6 }
  0x32   : > { %v246_v17 = vadd.f32 %v245_v15, %v244_v13  ;;  %v253_v18 = vadd.f32 %v252_v16, %v251_v14 }
  0x34   : > { %v247_v19 = vrot.slane %v246_v17, 1  ;;  %v254_v20 = vrot.slane %v253_v18, 1 }
  0x36   : > { %v248_v22 = vadd.f32 %v247_v19, %v246_v17  ;;  %v255_v23 = vadd.f32 %v254_v20, %v253_v18 }
  0x38   : > { %v259_v24 = vsel %vm258_vm3, %v255_v23, %v248_v22 }
  0x39   : > { %v261_v25 = vadd.f32 %v259_v24, %v238_v21 }
  0x3b   : > { %263 = vst.msk [vmem:[#allocation2] sm:$0x3] %vm236_vm0, %v261_v25 }
  0x42   : > { %v267_v26 = vld [vmem:[#allocation2] sm:$0x3] }
  0x43   : > { %v268_v27 = vmul.f32 0.0625, %v267_v26 }
  0x45   : > { %463 = vmatmul.mubr.msk.f32.vlgmr.msra.gmra.mxu0 %vm241_vm2, %v268_v27 }
 0x105   : > { %v342_v28 = vpop.f32.mrf.mxu0 }
 0x106   : > { %347 = vst.msk [vmem:[%s228_s11] sm:$0x3] %vm346_vm4, %v342_v28 }
 0x107   : > { %v464_v29 = vpop.f32.mrf.mxu0 }
 0x108   : > { %551 = shalt.err (!%p548_p10)
}
 0x109   : > { %s552_s28 = scalar_lea.hbm %s767_s23, 32  ;;  %s556_s8 = scalar_lea.hbm %s823_s3, 64 }
 0x10a   : > { %p553_p12 = scmp.ne.s32.totalorder %s767_s23, %s552_s28  ;;  %p557_p3 = scmp.lt.s32.totalorder %s767_s23, %s823_s3 }
 0x10b   : > { %p558_p4 = scmp.lt.s32.totalorder %s556_s8, %s552_s28 }
 0x10c   : > { %p554_p1 = pnand %p553_p12, %p725_p11 }
 0x10d   : > { %p559_p5 = por %p558_p4, %p557_p3 }
 0x10e   : > { %p555_p2 = pneg %p554_p1 }
 0x110   : > { %p560_p6 = pnand %p559_p5, %p555_p2 }
 0x112   : > { %563 = shalt.err (!%p560_p6)
}
 0x113   : > { %465 = dma.vmem_to_hbm [thread:$0]  (%p725_p11), %s769_s19, 32, %s767_s23, %s349_s24  }
 0x114 PF: > { %s374_s10 = sand.u32 1, %s602_s12   ;;  %p468_p7 = pnand %p438_p0, %p729_p13 }
 0x115   : > { %s375_s11 = scalar_lea.sflag [#allocation5], %s374_s10 }
 0x116   : > { %p469_p8 = pneg %p468_p7 }
 0x118   : > { %597 = dma.done.wait (%p469_p8), %s375_s11, 32  }
 0x119   : > { %599 = vsyncadd (%p469_p8), %s375_s11, 4294967264  ;;  %s16_s2 = sadd.s32 1, %s630_s2   ;;  %s827_s12 = smov %s606_s13 }
 0x11a   : > { %p13_p9 = scmp.ge.s32.totalorder %s16_s2, 4   ;;  %s828_s13 = smov %s610_s14 }
 0x11b   : > { %s829_s14 = smov %s720_s29  ;;  %s830_s15 = smov %s618_s16 }
 0x11c   : > { %s831_s16 = smov %s723_s30  ;;  %s832_s17 = smov %s626_s18 }
 0x11d   : > { %s833_s18 = smov %s835_s21  ;;  %15 = sbr.rel (!%p13_p9) target bundleno = 5 (0x5), region = 118 }
 0x122   :  { %380 = vsyncpa [#allocation5], 1 }
 0x123   :  { %382 = vsyncpa [#allocation5 + $0x1], 1 }

</bundles_post_ra>
